<compile_context>
chip_gen: v6e
topology: v6e:2x2x1
jax: 0.10.0
libtpu: 0.0.40
codegen_flags: <defaults>
</compile_context>

<pallas_src>
import functools

import jax
import jax.numpy as jnp
from jax.experimental import pallas as pl
from jax.experimental.pallas import tpu as pltpu


# ---------------------------------------------------------------------------
# Kernel
# ---------------------------------------------------------------------------
def _mlp_head_kernel(x_ref,
                     w1_ref, b1_ref,
                     w2_ref, b2_ref,
                     w3_ref, b3_ref,
                     w4_ref, b4_ref,
                     o_ref):
    """fc1->relu->fc2->relu->fc3->relu->fc4 on one (bm, C) batch tile.

    Matmuls: bf16 operands on the MXU, f32 accumulation.
    Bias add + ReLU: f32 on the VPU.  No ReLU after fc4 (matches PyTorch).
    """
    x = x_ref[...].astype(jnp.bfloat16)

    h = jnp.dot(x, w1_ref[...], preferred_element_type=jnp.float32) + b1_ref[...]
    h = jnp.maximum(h, 0.0)

    h = jnp.dot(h.astype(jnp.bfloat16), w2_ref[...],
                preferred_element_type=jnp.float32) + b2_ref[...]
    h = jnp.maximum(h, 0.0)

    h = jnp.dot(h.astype(jnp.bfloat16), w3_ref[...],
                preferred_element_type=jnp.float32) + b3_ref[...]
    h = jnp.maximum(h, 0.0)

    out = jnp.dot(h.astype(jnp.bfloat16), w4_ref[...],
                  preferred_element_type=jnp.float32) + b4_ref[...]
    o_ref[...] = out.astype(o_ref.dtype)


# ---------------------------------------------------------------------------
# Wrapper
# ---------------------------------------------------------------------------
def _round_up(x, m):
    return ((x + m - 1) // m) * m


def _pick_bm(B, block_m):
    """Batch tile: multiple of 8 sublanes, <= block_m, and (when B allows)
    sized so the grid has >= 2 steps for v7x megacore sharding."""
    if B <= 16:
        return B                                  # tiny-batch path: one step
    cap = max(8, (block_m // 8) * 8)
    n_steps = max(2, -(-B // cap))                # ceil(B / cap), at least 2
    bm = -(-B // n_steps)                         # ceil(B / n_steps)
    bm = -(-bm // 8) * 8                          # round up to sublane multiple
    return min(bm, cap)


@functools.partial(jax.jit, static_argnames=("n_classes", "block_m"))
def caption_view_prediction_head(x, params, n_classes=8, block_m=512):
    """JAX/Pallas equivalent of CaptionViewPredictionHead.forward.

    x: any array whose trailing dims flatten to in_channels (e.g. (B, 2, 16, 16)).
    params: *prepared* params (see prepare_params): bf16 weights (in, out) with
            fc3/fc4 output dims zero-padded to multiples of 128; f32 biases (1, out).
    Returns f32 logits of shape (B, n_classes), matching the PyTorch head.
    """
    B = x.shape[0]
    x2d = x.reshape(B, -1).astype(jnp.bfloat16)   # flatten(start_dim=1) + bf16 DMA
    in_ch = x2d.shape[1]
    assert in_ch == params["w1"].shape[0], (in_ch, params["w1"].shape)
    n_out_pad = params["w4"].shape[1]             # 128-padded class dim

    bm = _pick_bm(B, block_m)
    grid = (pl.cdiv(B, bm),)

    # Full (small) weight/bias tensors stay VMEM-resident across grid steps
    # (constant block index); only the activations are tiled along batch.
    def full_spec(shape):
        return pl.BlockSpec(shape, lambda i: (0, 0))

    out = pl.pallas_call(
        _mlp_head_kernel,
        out_shape=jax.ShapeDtypeStruct((B, n_out_pad), jnp.float32),
        grid_spec=pltpu.PrefetchScalarGridSpec(
            num_scalar_prefetch=0,
            grid=grid,
            in_specs=[
                pl.BlockSpec((bm, in_ch), lambda i: (i, 0)),
                full_spec(params["w1"].shape), full_spec(params["b1"].shape),
                full_spec(params["w2"].shape), full_spec(params["b2"].shape),
                full_spec(params["w3"].shape), full_spec(params["b3"].shape),
                full_spec(params["w4"].shape), full_spec(params["b4"].shape),
            ],
            out_specs=pl.BlockSpec((bm, n_out_pad), lambda i: (i, 0)),
        ),
        compiler_params=pltpu.CompilerParams(
            dimension_semantics=("parallel",)),
    )(x2d,
      params["w1"], params["b1"],
      params["w2"], params["b2"],
      params["w3"], params["b3"],
      params["w4"], params["b4"])

    return out[:, :n_classes]                     # drop the zero padding


# ---------------------------------------------------------------------------
# Parameter handling
# ---------------------------------------------------------------------------
def init_params(key, in_channels=512, n_classes=8, dtype=jnp.float32):
    """Synthetic init matching nn.Linear shapes (weights stored as (in, out))."""
    dims = [in_channels, 256, 128, 64, n_classes]
    params = {}
    for li in range(4):
        fan_in, fan_out = dims[li], dims[li + 1]
        key, kw, kb = jax.random.split(key, 3)
        bound = 1.0 / (fan_in ** 0.5)             # PyTorch default init bound
        params[f"w{li+1}"] = jax.random.uniform(
            kw, (fan_in, fan_out), dtype, minval=-bound, maxval=bound)
        params[f"b{li+1}"] = jax.random.uniform(
            kb, (1, fan_out), dtype, minval=-bound, maxval=bound)
    return params


def prepare_params(params):
    """One-time prep for the kernel: cast weights to bf16, keep biases f32,
    and zero-pad each layer's output dim (and the next layer's input dim)
    up to a multiple of 128 for lane-dense MXU/VPU tiles."""
    prepared = {}
    prev_pad = 0
    for li in range(1, 5):
        w = params[f"w{li}"]
        b = params[f"b{li}"]
        fan_out = w.shape[1]
        out_pad = _round_up(fan_out, 128) - fan_out
        prepared[f"w{li}"] = jnp.pad(w, ((0, prev_pad), (0, out_pad))
                                     ).astype(jnp.bfloat16)
        prepared[f"b{li}"] = jnp.pad(b, ((0, 0), (0, out_pad))
                                     ).astype(jnp.float32)
        prev_pad = out_pad
    return prepared


# ---------------------------------------------------------------------------
# Reference (mirrors the kernel's bf16-operand / f32-accumulate path)
# ---------------------------------------------------------------------------
def _reference_bf16(x, params):
    h = x.reshape(x.shape[0], -1).astype(jnp.bfloat16)
    for li in range(1, 4):
        w = params[f"w{li}"].astype(jnp.bfloat16)
        h = jnp.dot(h, w, preferred_element_type=jnp.float32) + params[f"b{li}"]
        h = jnp.maximum(h, 0.0).astype(jnp.bfloat16)
    w4 = params["w4"].astype(jnp.bfloat16)
    return jnp.dot(h, w4, preferred_element_type=jnp.float32) + params["b4"]


# ---------------------------------------------------------------------------
if __name__ == "__main__":
    key = jax.random.PRNGKey(0)
    k_param, k_x = jax.random.split(key)

    in_channels = 512
    n_classes = 8
    batch = 2

    params = init_params(k_param, in_channels=in_channels, n_classes=n_classes)
    pparams = prepare_params(params)

    # Caption embeddings shaped (B, 2, 16, 16): flatten(start_dim=1) -> (B, 512).
    x = jax.random.normal(k_x, (batch, 2, 16, 16), dtype=jnp.float32)

    out = caption_view_prediction_head(x, pparams, n_classes=n_classes)
    out = jax.block_until_ready(out)

    ref = _reference_bf16(x, params)
    assert out.shape == (batch, n_classes), out.shape
    assert jnp.allclose(out, ref, atol=2e-3, rtol=2e-3), "mismatch vs reference"

    print("KERNEL_OK")
</pallas_src>

<mosaic_0001>
module attributes {stable_mosaic.version = 11 : i64} {
  func.func @_mlp_head_kernel(%arg0: i32, %arg1: memref<2x512xbf16, #tpu.memory_space<vmem>>, %arg2: memref<512x256xbf16, #tpu.memory_space<vmem>>, %arg3: memref<1x256xf32, #tpu.memory_space<vmem>>, %arg4: memref<256x128xbf16, #tpu.memory_space<vmem>>, %arg5: memref<1x128xf32, #tpu.memory_space<vmem>>, %arg6: memref<128x128xbf16, #tpu.memory_space<vmem>>, %arg7: memref<1x128xf32, #tpu.memory_space<vmem>>, %arg8: memref<128x128xbf16, #tpu.memory_space<vmem>>, %arg9: memref<1x128xf32, #tpu.memory_space<vmem>>, %arg10: memref<2x128xf32, #tpu.memory_space<vmem>>) attributes {dimension_semantics = [#tpu.dimension_semantics<parallel>], iteration_bounds = array<i64: 1>, scalar_prefetch = 0 : i64, scratch_operands = 0 : i64, tpu.core_type = #tpu.core_type<tc>, window_params = [{transform_indices = @transform_0, window_bounds = array<i64: 2, 512>}, {pipeline_mode = #tpu.pipeline_mode<synchronous>, transform_indices = @transform_1, window_bounds = array<i64: 512, 256>}, {pipeline_mode = #tpu.pipeline_mode<synchronous>, transform_indices = @transform_2, window_bounds = array<i64: 1, 256>}, {pipeline_mode = #tpu.pipeline_mode<synchronous>, transform_indices = @transform_3, window_bounds = array<i64: 256, 128>}, {pipeline_mode = #tpu.pipeline_mode<synchronous>, transform_indices = @transform_4, window_bounds = array<i64: 1, 128>}, {pipeline_mode = #tpu.pipeline_mode<synchronous>, transform_indices = @transform_5, window_bounds = array<i64: 128, 128>}, {pipeline_mode = #tpu.pipeline_mode<synchronous>, transform_indices = @transform_6, window_bounds = array<i64: 1, 128>}, {pipeline_mode = #tpu.pipeline_mode<synchronous>, transform_indices = @transform_7, window_bounds = array<i64: 128, 128>}, {pipeline_mode = #tpu.pipeline_mode<synchronous>, transform_indices = @transform_8, window_bounds = array<i64: 1, 128>}, {transform_indices = @transform_9, window_bounds = array<i64: 2, 128>}]} {
    %c0 = arith.constant 0 : index
    %c0_0 = arith.constant 0 : index
    %0 = vector.load %arg1[%c0, %c0_0] : memref<2x512xbf16, #tpu.memory_space<vmem>>, vector<2x512xbf16>
    %c0_1 = arith.constant 0 : index
    %c0_2 = arith.constant 0 : index
    %1 = vector.load %arg2[%c0_1, %c0_2] : memref<512x256xbf16, #tpu.memory_space<vmem>>, vector<512x256xbf16>
    %cst = arith.constant dense<0.000000e+00> : vector<2x256xf32>
    %2 = tpu.matmul %0, %1, %cst {dimension_numbers = #tpu.dot_dimension_numbers<[1], [0], [0], [1], [0, 0, 1, 1], [], []>} : vector<2x512xbf16>, vector<512x256xbf16>, vector<2x256xf32> -> vector<2x256xf32>
    %c0_3 = arith.constant 0 : index
    %c0_4 = arith.constant 0 : index
    %3 = vector.load %arg3[%c0_3, %c0_4] : memref<1x256xf32, #tpu.memory_space<vmem>>, vector<1x256xf32>
    %4 = vector.broadcast %3 : vector<1x256xf32> to vector<2x256xf32>
    %5 = arith.addf %2, %4 : vector<2x256xf32>
    %cst_5 = arith.constant 0.000000e+00 : f32
    %6 = vector.broadcast %cst_5 : f32 to vector<2x256xf32>
    %7 = arith.maximumf %5, %6 : vector<2x256xf32>
    %8 = arith.truncf %7 : vector<2x256xf32> to vector<2x256xbf16>
    %c0_6 = arith.constant 0 : index
    %c0_7 = arith.constant 0 : index
    %9 = vector.load %arg4[%c0_6, %c0_7] : memref<256x128xbf16, #tpu.memory_space<vmem>>, vector<256x128xbf16>
    %cst_8 = arith.constant dense<0.000000e+00> : vector<2x128xf32>
    %10 = tpu.matmul %8, %9, %cst_8 {dimension_numbers = #tpu.dot_dimension_numbers<[1], [0], [0], [1], [0, 0, 1, 1], [], []>} : vector<2x256xbf16>, vector<256x128xbf16>, vector<2x128xf32> -> vector<2x128xf32>
    %c0_9 = arith.constant 0 : index
    %c0_10 = arith.constant 0 : index
    %11 = vector.load %arg5[%c0_9, %c0_10] : memref<1x128xf32, #tpu.memory_space<vmem>>, vector<1x128xf32>
    %12 = vector.broadcast %11 : vector<1x128xf32> to vector<2x128xf32>
    %13 = arith.addf %10, %12 : vector<2x128xf32>
    %cst_11 = arith.constant 0.000000e+00 : f32
    %14 = vector.broadcast %cst_11 : f32 to vector<2x128xf32>
    %15 = arith.maximumf %13, %14 : vector<2x128xf32>
    %16 = arith.truncf %15 : vector<2x128xf32> to vector<2x128xbf16>
    %c0_12 = arith.constant 0 : index
    %c0_13 = arith.constant 0 : index
    %17 = vector.load %arg6[%c0_12, %c0_13] : memref<128x128xbf16, #tpu.memory_space<vmem>>, vector<128x128xbf16>
    %cst_14 = arith.constant dense<0.000000e+00> : vector<2x128xf32>
    %18 = tpu.matmul %16, %17, %cst_14 {dimension_numbers = #tpu.dot_dimension_numbers<[1], [0], [0], [1], [0, 0, 1, 1], [], []>} : vector<2x128xbf16>, vector<128x128xbf16>, vector<2x128xf32> -> vector<2x128xf32>
    %c0_15 = arith.constant 0 : index
    %c0_16 = arith.constant 0 : index
    %19 = vector.load %arg7[%c0_15, %c0_16] : memref<1x128xf32, #tpu.memory_space<vmem>>, vector<1x128xf32>
    %20 = vector.broadcast %19 : vector<1x128xf32> to vector<2x128xf32>
    %21 = arith.addf %18, %20 : vector<2x128xf32>
    %cst_17 = arith.constant 0.000000e+00 : f32
    %22 = vector.broadcast %cst_17 : f32 to vector<2x128xf32>
    %23 = arith.maximumf %21, %22 : vector<2x128xf32>
    %24 = arith.truncf %23 : vector<2x128xf32> to vector<2x128xbf16>
    %c0_18 = arith.constant 0 : index
    %c0_19 = arith.constant 0 : index
    %25 = vector.load %arg8[%c0_18, %c0_19] : memref<128x128xbf16, #tpu.memory_space<vmem>>, vector<128x128xbf16>
    %cst_20 = arith.constant dense<0.000000e+00> : vector<2x128xf32>
    %26 = tpu.matmul %24, %25, %cst_20 {dimension_numbers = #tpu.dot_dimension_numbers<[1], [0], [0], [1], [0, 0, 1, 1], [], []>} : vector<2x128xbf16>, vector<128x128xbf16>, vector<2x128xf32> -> vector<2x128xf32>
    %c0_21 = arith.constant 0 : index
    %c0_22 = arith.constant 0 : index
    %27 = vector.load %arg9[%c0_21, %c0_22] : memref<1x128xf32, #tpu.memory_space<vmem>>, vector<1x128xf32>
    %28 = vector.broadcast %27 : vector<1x128xf32> to vector<2x128xf32>
    %29 = arith.addf %26, %28 : vector<2x128xf32>
    %c0_23 = arith.constant 0 : index
    %c0_24 = arith.constant 0 : index
    %30 = vector.load %arg10[%c0_23, %c0_24] : memref<2x128xf32, #tpu.memory_space<vmem>>, vector<2x128xf32>
    tpu.vector_store %arg10[%c0_23, %c0_24], %29 {strides = array<i32>} : memref<2x128xf32, #tpu.memory_space<vmem>>, vector<2x128xf32>,
    return
  }
  func.func @transform_0(%arg0: i32) -> (i32, i32) {
    %c0_i32 = arith.constant 0 : i32
    %c0_i32_0 = arith.constant 0 : i32
    return %arg0, %c0_i32 : i32, i32
  }
  func.func @transform_1(%arg0: i32) -> (i32, i32) {
    %c0_i32 = arith.constant 0 : i32
    %c0_i32_0 = arith.constant 0 : i32
    %c0_i32_1 = arith.constant 0 : i32
    return %c0_i32, %c0_i32_0 : i32, i32
  }
  func.func @transform_2(%arg0: i32) -> (i32, i32) {
    %c0_i32 = arith.constant 0 : i32
    %c0_i32_0 = arith.constant 0 : i32
    %c0_i32_1 = arith.constant 0 : i32
    return %c0_i32, %c0_i32_0 : i32, i32
  }
  func.func @transform_3(%arg0: i32) -> (i32, i32) {
    %c0_i32 = arith.constant 0 : i32
    %c0_i32_0 = arith.constant 0 : i32
    %c0_i32_1 = arith.constant 0 : i32
    return %c0_i32, %c0_i32_0 : i32, i32
  }
  func.func @transform_4(%arg0: i32) -> (i32, i32) {
    %c0_i32 = arith.constant 0 : i32
    %c0_i32_0 = arith.constant 0 : i32
    %c0_i32_1 = arith.constant 0 : i32
    return %c0_i32, %c0_i32_0 : i32, i32
  }
  func.func @transform_5(%arg0: i32) -> (i32, i32) {
    %c0_i32 = arith.constant 0 : i32
    %c0_i32_0 = arith.constant 0 : i32
    %c0_i32_1 = arith.constant 0 : i32
    return %c0_i32, %c0_i32_0 : i32, i32
  }
  func.func @transform_6(%arg0: i32) -> (i32, i32) {
    %c0_i32 = arith.constant 0 : i32
    %c0_i32_0 = arith.constant 0 : i32
    %c0_i32_1 = arith.constant 0 : i32
    return %c0_i32, %c0_i32_0 : i32, i32
  }
  func.func @transform_7(%arg0: i32) -> (i32, i32) {
    %c0_i32 = arith.constant 0 : i32
    %c0_i32_0 = arith.constant 0 : i32
    %c0_i32_1 = arith.constant 0 : i32
    return %c0_i32, %c0_i32_0 : i32, i32
  }
  func.func @transform_8(%arg0: i32) -> (i32, i32) {
    %c0_i32 = arith.constant 0 : i32
    %c0_i32_0 = arith.constant 0 : i32
    %c0_i32_1 = arith.constant 0 : i32
    return %c0_i32, %c0_i32_0 : i32, i32
  }
  func.func @transform_9(%arg0: i32) -> (i32, i32) {
    %c0_i32 = arith.constant 0 : i32
    %c0_i32_0 = arith.constant 0 : i32
    return %arg0, %c0_i32 : i32, i32
  }
}

</mosaic_0001>

<bundles_post_ra>
// kernel: caption_view_prediction_head.1
= control target key start
LH: loop header
LB: loop body
LE: loop exit
PB: predicated region body
PF: predicated region fallthrough
CT: control target
= control target key end

     0   :  { %14 = vsyncpa [#allocation3], 0  ;;  %s1569_s0 = inlined_call_operand.vmem [shape: bf16[2,512], index: 0, kind: input, shape index: {}]   ;;  %s1570_s1 = inlined_call_operand.hbm [shape: bf16[512,256], index: 1, kind: input, shape index: {}]   ;;  %s1571_s2 = inlined_call_operand.vmem [shape: f32[1,256], index: 2, kind: input, shape index: {}]   ;;  %s1572_s3 = inlined_call_operand.vmem [shape: bf16[256,128], index: 3, kind: input, shape index: {}]   ;;  %s1573_s4 = inlined_call_operand.vmem [shape: f32[1,128], index: 4, kind: input, shape index: {}]   ;;  %s1574_s5 = inlined_call_operand.hbm [shape: bf16[128,128], index: 5, kind: input, shape index: {}]   ;;  %s1575_s6 = inlined_call_operand.vmem [shape: f32[1,128], index: 6, kind: input, shape index: {}]   ;;  %s1576_s7 = inlined_call_operand.hbm [shape: bf16[128,128], index: 7, kind: input, shape index: {}]   ;;  %s1577_s8 = inlined_call_operand.vmem [shape: f32[1,128], index: 8, kind: input, shape index: {}]   ;;  %s1578_s9 = inlined_call_operand.hbm [shape: f32[2,128], index: 9, kind: output, shape index: {}]  }
   0x1   :  { %15 = vsyncpa [#allocation6], 0 }
   0x2   :  { %16 = vsyncpa [#allocation4], 0  ;;  %s1410_s30 = smov [#allocation5]  }
   0x3   :  { %s42_s10 = sshll.u32 %s1410_s30, 4  ;;  %s43_s10 = int_to_ptr.vmem [resolvable:$true] %s42_s10 }
   0x4   :  { %s1332_s11 = scalar_lea.vmem %s43_s10, 1024  ;;  %p1337_p1 = scmp.lt.s32.totalorder %s43_s10, %s43_s10 }
   0x5   :  { %p1333_p0 = scmp.ne.s32.totalorder %s43_s10, %s1332_s11  ;;  %p1338_p2 = scmp.lt.s32.totalorder %s1332_s11, %s1332_s11 }
   0x7   :  { %p1339_p3 = por %p1338_p2, %p1337_p1 }
   0x9   :  { %p1340_p4 = pnand %p1339_p3, %p1333_p0 }
   0xb   :  { %1343 = shalt.err (!%p1340_p4)
}
   0xc   :  { %s1411_s12 = smov 64   ;;  %s1412_s13 = smov 4  }
   0xd   :  { %48 = dma.hbm_to_vmem [thread:$0]  %s1574_s5, 1024, %s43_s10, [#allocation6], %s1411_s12, %s1411_s12, %s1412_s13  }
   0xe   :  { %s1413_s16 = smov [#allocation2]  }
   0xf   :  { %s24_s17 = sshll.u32 %s1413_s16, 4  ;;  %s25_s17 = int_to_ptr.vmem [resolvable:$true] %s24_s17 }
  0x10   :  { %s1352_s18 = scalar_lea.vmem %s25_s17, 8192  ;;  %p1357_p6 = scmp.lt.s32.totalorder %s25_s17, %s25_s17 }
  0x11   :  { %p1353_p5 = scmp.ne.s32.totalorder %s25_s17, %s1352_s18  ;;  %p1358_p7 = scmp.lt.s32.totalorder %s1352_s18, %s1352_s18 }
  0x13   :  { %p1359_p8 = por %p1358_p7, %p1357_p6 }
  0x15   :  { %p1360_p9 = pnand %p1359_p8, %p1353_p5 }
  0x17   :  { %1363 = shalt.err (!%p1360_p9)
}
  0x18   :  { %s1414_s19 = smov 128   ;;  %s1415_s20 = smov 8  }
  0x19   :  { %30 = dma.hbm_to_vmem [thread:$0]  %s1570_s1, 8192, %s25_s17, [#allocation3], %s1414_s19, %s1414_s19, %s1415_s20  }
  0x1a   :  { %s1416_s23 = smov [#allocation7]  }
  0x1b   :  { %s56_s24 = sshll.u32 %s1416_s23, 4  ;;  %s57_s24 = int_to_ptr.vmem [resolvable:$true] %s56_s24 }
  0x1c   :  { %s1372_s5 = scalar_lea.vmem %s57_s24, 1024  ;;  %p1377_p11 = scmp.lt.s32.totalorder %s57_s24, %s57_s24 }
  0x1d   :  { %p1373_p10 = scmp.ne.s32.totalorder %s57_s24, %s1372_s5  ;;  %p1378_p12 = scmp.lt.s32.totalorder %s1372_s5, %s1372_s5 }
  0x1f   :  { %p1379_p13 = por %p1378_p12, %p1377_p11 }
  0x21   :  { %p1380_p0 = pnand %p1379_p13, %p1373_p10 }
  0x23   :  { %1383 = shalt.err (!%p1380_p0)
}
  0x24   :  { %62 = dma.hbm_to_vmem [thread:$0]  %s1576_s7, 1024, %s57_s24, [#allocation6], %s1411_s12, %s1411_s12, %s1412_s13  }
  0x25   :  { %1404 = dma.done.wait [#allocation3], 8192  }
  0x26   :  { %1405 = vsyncadd [#allocation3], 4294959104 }
  0x27   :  { %1406 = dma.done.wait [#allocation6], 2048  }
  0x28   :  { %1407 = vsyncadd [#allocation6], 4294965248  ;;  %v1196_v0 = vld [vmem:[#allocation2 + $0x74] ss:$8 sps:$4 sm:$0xff]   ;;  %v1200_v2 = vld [vmem:[#allocation2 + $0x70] ss:$8 sps:$4 sm:$0xff]   ;;  %v142_v38 = vlaneseq }
  0x29   :  { %v1198_v1 = vld [vmem:[#allocation2 + $0x174] ss:$8 sps:$4 sm:$0xff]   ;;  %501 = vmatprep.subr.bf16.mxu0 %v1196_v0  ;;  %v1201_v3 = vld [vmem:[#allocation2 + $0x170] ss:$8 sps:$4 sm:$0xff]   ;;  %v1202_v4 = vld [vmem:[#allocation2 + $0x64] ss:$8 sps:$4 sm:$0xff]  }
  0x2a   :  { %542 = vmatprep.subr.bf16.mxu1 %v1198_v1  ;;  %502 = vmatpush1.bf16.msra.mxu0 %v1200_v2  ;;  %v1204_v5 = vld [vmem:[#allocation2 + $0x164] ss:$8 sps:$4 sm:$0xff]   ;;  %v1206_v6 = vld [vmem:[#allocation2 + $0x60] ss:$8 sps:$4 sm:$0xff]   ;;  %v1208_v8 = vld [vmem:[#allocation2 + $0x54] ss:$8 sps:$4 sm:$0xff]  }
  0x2b   :  { %543 = vmatpush1.bf16.msra.mxu1 %v1201_v3  ;;  %503 = vmatprep.subr.bf16.mxu0 %v1202_v4  ;;  %v1207_v7 = vld [vmem:[#allocation2 + $0x160] ss:$8 sps:$4 sm:$0xff]   ;;  %v1210_v9 = vld [vmem:[#allocation2 + $0x154] ss:$8 sps:$4 sm:$0xff]   ;;  %v1212_v10 = vld [vmem:[#allocation2 + $0x50] ss:$8 sps:$4 sm:$0xff]  }
  0x2c   :  { %544 = vmatprep.subr.bf16.mxu1 %v1204_v5  ;;  %v1213_v11 = vld [vmem:[#allocation2 + $0x150] ss:$8 sps:$4 sm:$0xff]   ;;  %v1214_v12 = vld [vmem:[#allocation2 + $0x44] ss:$8 sps:$4 sm:$0xff]   ;;  %v1218_v14 = vld [vmem:[#allocation2 + $0x40] ss:$8 sps:$4 sm:$0xff]  }
  0x2d   :  { %v1216_v13 = vld [vmem:[#allocation2 + $0x144] ss:$8 sps:$4 sm:$0xff]   ;;  %v1219_v15 = vld [vmem:[#allocation2 + $0x140] ss:$8 sps:$4 sm:$0xff]   ;;  %v1220_v16 = vld [vmem:[#allocation2 + $0x34] ss:$8 sps:$4 sm:$0xff]  }
  0x2e   :  { %504 = vmatpush1.bf16.msra.mxu0 %v1206_v6  ;;  %v1222_v17 = vld [vmem:[#allocation2 + $0x134] ss:$8 sps:$4 sm:$0xff]   ;;  %v1224_v18 = vld [vmem:[#allocation2 + $0x30] ss:$8 sps:$4 sm:$0xff]   ;;  %v1226_v20 = vld [vmem:[#allocation2 + $0x24] ss:$8 sps:$4 sm:$0xff]  }
  0x2f   :  { %545 = vmatpush1.bf16.msra.mxu1 %v1207_v7  ;;  %505 = vmatprep.subr.bf16.mxu0 %v1208_v8  ;;  %v1225_v19 = vld [vmem:[#allocation2 + $0x130] ss:$8 sps:$4 sm:$0xff]   ;;  %v1228_v21 = vld [vmem:[#allocation2 + $0x124] ss:$8 sps:$4 sm:$0xff]   ;;  %v1230_v22 = vld [vmem:[#allocation2 + $0x20] ss:$8 sps:$4 sm:$0xff]  }
  0x30   :  { %546 = vmatprep.subr.bf16.mxu1 %v1210_v9  ;;  %v1231_v23 = vld [vmem:[#allocation2 + $0x120] ss:$8 sps:$4 sm:$0xff]   ;;  %v1232_v24 = vld [vmem:[#allocation2 + $0x14] ss:$8 sps:$4 sm:$0xff]   ;;  %v1236_v26 = vld [vmem:[#allocation2 + $0x10] ss:$8 sps:$4 sm:$0xff]  }
  0x31   :  { %v1234_v25 = vld [vmem:[#allocation2 + $0x114] ss:$8 sps:$4 sm:$0xff]   ;;  %v1237_v27 = vld [vmem:[#allocation2 + $0x110] ss:$8 sps:$4 sm:$0xff]   ;;  %v1238_v28 = vld [vmem:[#allocation2 + $0x4] ss:$8 sps:$4 sm:$0xff]  }
  0x32   :  { %506 = vmatpush1.bf16.msra.mxu0 %v1212_v10  ;;  %v1240_v29 = vld [vmem:[#allocation2 + $0x104] ss:$8 sps:$4 sm:$0xff]   ;;  %v1242_v30 = vld [vmem:[#allocation2] ss:$8 sps:$4 sm:$0xff]   ;;  %v1244_v32 = vld [vmem:[#allocation2 + $0xf4] ss:$8 sps:$4 sm:$0xff]  }
  0x33   :  { %547 = vmatpush1.bf16.msra.mxu1 %v1213_v11  ;;  %507 = vmatprep.subr.bf16.mxu0 %v1214_v12  ;;  %v1243_v31 = vld [vmem:[#allocation2 + $0x100] ss:$8 sps:$4 sm:$0xff]   ;;  %v1246_v33 = vld [vmem:[#allocation2 + $0x1f4] ss:$8 sps:$4 sm:$0xff]   ;;  %v1248_v34 = vld [vmem:[#allocation2 + $0xf0] ss:$8 sps:$4 sm:$0xff]  }
  0x34   :  { %548 = vmatprep.subr.bf16.mxu1 %v1216_v13  ;;  %v1249_v35 = vld [vmem:[#allocation2 + $0x1f0] ss:$8 sps:$4 sm:$0xff]   ;;  %v1250_v36 = vld [vmem:[#allocation2 + $0xe4] ss:$8 sps:$4 sm:$0xff]   ;;  %v1417_v39 = vmov 1966171168  }
  0x35   :  { %v1252_v37 = vld [vmem:[#allocation2 + $0x1e4] ss:$8 sps:$4 sm:$0xff]   ;;  %v162_v40 = vunpack.c.l.s4 %v1417_v39  ;;  %v1254_v41 = vld [vmem:[#allocation2 + $0xe0] ss:$8 sps:$4 sm:$0xff]   ;;  %v1256_v43 = vld [vmem:[#allocation2 + $0xd4] ss:$8 sps:$4 sm:$0xff]  }
  0x36   :  { %508 = vmatpush1.bf16.msra.mxu0 %v1218_v14  ;;  %v1255_v42 = vld [vmem:[#allocation2 + $0x1e0] ss:$8 sps:$4 sm:$0xff]   ;;  %v1258_v44 = vld [vmem:[#allocation2 + $0x1d4] ss:$8 sps:$4 sm:$0xff]   ;;  %v1480_v45 = vshrl.u32 %v142_v38, 7  ;;  %vm1419_vm0 = vmmov 0  }
  0x37   :  { %549 = vmatpush1.bf16.msra.mxu1 %v1219_v15  ;;  %509 = vmatprep.subr.bf16.mxu0 %v1220_v16  ;;  %v163_v46 = vunpack.c.0.s8 %v162_v40  ;;  %v1260_v47 = vld [vmem:[#allocation2 + $0xd0] ss:$8 sps:$4 sm:$0xff]   ;;  %v1262_v49 = vld [vmem:[#allocation2 + $0xc4] ss:$8 sps:$4 sm:$0xff]   ;;  %v1266_v51 = vld [vmem:[#allocation2 + $0xc0] ss:$8 sps:$4 sm:$0xff]  }
  0x38   :  { %550 = vmatprep.subr.bf16.mxu1 %v1222_v17  ;;  %v1261_v48 = vld [vmem:[#allocation2 + $0x1d0] ss:$8 sps:$4 sm:$0xff]   ;;  %v1264_v50 = vld [vmem:[#allocation2 + $0x1c4] ss:$8 sps:$4 sm:$0xff]   ;;  %v1267_v52 = vld [vmem:[#allocation2 + $0x1c0] ss:$8 sps:$4 sm:$0xff]  }
  0x39   :  { %v166_v53 = vsub.s32 %v163_v46, %v1480_v45  ;;  %v1005_v54 = vld.sshfl [vmem:[%s1569_s0] sm:$0x33 pattern:$0x75316420]  ;;  %v1268_v55 = vld [vmem:[#allocation2 + $0xb4] ss:$8 sps:$4 sm:$0xff]  }
  0x3a   :  { %510 = vmatpush1.bf16.msra.mxu0 %v1224_v18  ;;  %v160_v56 = vcombine.high %v1005_v54, %v1005_v54  ;;  %v1270_v57 = vld [vmem:[#allocation2 + $0x1b4] ss:$8 sps:$4 sm:$0xff]   ;;  %v1272_v58 = vld [vmem:[#allocation2 + $0xb0] ss:$8 sps:$4 sm:$0xff]   ;;  %v1274_v61 = vld [vmem:[#allocation2 + $0xa4] ss:$8 sps:$4 sm:$0xff]  }
  0x3b   :  { %551 = vmatpush1.bf16.msra.mxu1 %v1225_v19  ;;  %511 = vmatprep.subr.bf16.mxu0 %v1226_v20  ;;  %v1273_v60 = vld [vmem:[#allocation2 + $0x1b0] ss:$8 sps:$4 sm:$0xff]   ;;  %v1276_v63 = vld [vmem:[#allocation2 + $0x1a4] ss:$8 sps:$4 sm:$0xff]   ;;  %v1278_v0 = vld [vmem:[#allocation2 + $0xa0] ss:$8 sps:$4 sm:$0xff]   ;;  %v167_v10 = vrot.slane %v1005_v54, %v166_v53 }
  0x3c   :  { %552 = vmatprep.subr.bf16.mxu1 %v1228_v21  ;;  %v174_v59 = vrot.slane %v160_v56, %v166_v53  ;;  %v1279_v1 = vld [vmem:[#allocation2 + $0x1a0] ss:$8 sps:$4 sm:$0xff]   ;;  %v1280_v2 = vld [vmem:[#allocation2 + $0x94] ss:$8 sps:$4 sm:$0xff]   ;;  %v1284_v4 = vld [vmem:[#allocation2 + $0x90] ss:$8 sps:$4 sm:$0xff]  }
  0x3d   :  { %v1282_v3 = vld [vmem:[#allocation2 + $0x194] ss:$8 sps:$4 sm:$0xff]   ;;  %v1285_v5 = vld [vmem:[#allocation2 + $0x190] ss:$8 sps:$4 sm:$0xff]   ;;  %v1286_v6 = vld [vmem:[#allocation2 + $0x84] ss:$8 sps:$4 sm:$0xff]   ;;  %v175_v13 = vcombine.high %v167_v10, %v167_v10 }
  0x3e   :  { %512 = vmatpush1.bf16.msra.mxu0 %v1230_v22  ;;  %v176_v62 = vcombine.high %v174_v59, %v174_v59  ;;  %533 = vmatprep.mubr.bf16.mxu0 %v174_v59  ;;  %v1288_v7 = vld [vmem:[#allocation2 + $0x184] ss:$8 sps:$4 sm:$0xff]   ;;  %v1290_v8 = vld [vmem:[#allocation2 + $0x80] ss:$8 sps:$4 sm:$0xff]   ;;  %v1292_v11 = vld [vmem:[%s1572_s3 + $0x78] sm:$0xff]   ;;  %s1420_s17 = smov [#allocation8]  }
  0x3f   :  { %553 = vmatpush1.bf16.msra.mxu1 %v1231_v23  ;;  %513 = vmatprep.subr.bf16.mxu0 %v1232_v24  ;;  %v1291_v9 = vld [vmem:[#allocation2 + $0x180] ss:$8 sps:$4 sm:$0xff]   ;;  %v1293_v12 = vld [vmem:[%s1572_s3 + $0x38] sm:$0xff]   ;;  %v1294_v14 = vld [vmem:[%s1572_s3 + $0x70] sm:$0xff]   ;;  %s995_s18 = sshll.u32 %s1420_s17, 4  ;;  %s996_s18 = int_to_ptr.vmem [resolvable:$true] %s995_s18 }
  0x40   :  { %554 = vmatprep.subr.bf16.mxu1 %v1234_v25  ;;  %574 = vmatprep.mubr.bf16.mxu1 %v176_v62  ;;  %v1295_v15 = vld [vmem:[%s1572_s3 + $0x30] sm:$0xff]   ;;  %v1296_v16 = vld [vmem:[%s1572_s3 + $0x68] sm:$0xff]   ;;  %v1298_v18 = vld [vmem:[%s1572_s3 + $0x60] sm:$0xff]   ;;  %p1389_p2 = scmp.lt.s32.totalorder %s996_s18, %s996_s18 }
  0x41   :  { %v1297_v17 = vld [vmem:[%s1572_s3 + $0x28] sm:$0xff]   ;;  %v1299_v19 = vld [vmem:[%s1572_s3 + $0x20] sm:$0xff]   ;;  %v1300_v20 = vld [vmem:[%s1572_s3 + $0x58] sm:$0xff]  }
  0x42   :  { %514 = vmatpush1.bf16.msra.mxu0 %v1236_v26  ;;  %v1301_v21 = vld [vmem:[%s1572_s3 + $0x18] sm:$0xff]   ;;  %v1302_v22 = vld [vmem:[%s1572_s3 + $0x50] sm:$0xff]   ;;  %v1304_v24 = vld [vmem:[%s1572_s3 + $0x48] sm:$0xff]  }
  0x43   :  { %555 = vmatpush1.bf16.msra.mxu1 %v1237_v27  ;;  %515 = vmatprep.subr.bf16.mxu0 %v1238_v28  ;;  %v1303_v23 = vld [vmem:[%s1572_s3 + $0x10] sm:$0xff]   ;;  %v1305_v25 = vld [vmem:[%s1572_s3 + $0x8] sm:$0xff]   ;;  %v1306_v26 = vld [vmem:[%s1572_s3 + $0x40] sm:$0xff]  }
  0x44   :  { %556 = vmatprep.subr.bf16.mxu1 %v1240_v29  ;;  %v1307_v27 = vld [vmem:[%s1572_s3] sm:$0xff]   ;;  %v1308_v28 = vld [vmem:[#allocation5 + $0x38] sm:$0xff]   ;;  %v1418_v29 = vmov 0.0   ;;  %v1314_v56 = vld [vmem:[#allocation5 + $0x8] sm:$0xff]  }
  0x45   :  { %v1317_v59 = vld [vmem:[#allocation7 + $0x30] sm:$0xff]   ;;  %v1320_v62 = vld [vmem:[#allocation7 + $0x18] sm:$0xff]  }
  0x46   :  { %516 = vmatpush1.bf16.msra.mxu0 %v1242_v30  ;;  %v1309_v30 = vld [vmem:[#allocation5 + $0x30] sm:$0xff]  }
  0x47   :  { %557 = vmatpush1.bf16.msra.mxu1 %v1243_v31  ;;  %517 = vmatprep.subr.bf16.mxu0 %v1244_v32  ;;  %v1310_v31 = vld [vmem:[#allocation5 + $0x28] sm:$0xff]   ;;  %v1311_v32 = vld [vmem:[#allocation5 + $0x20] sm:$0xff]  }
  0x48   :  { %558 = vmatprep.subr.bf16.mxu1 %v1246_v33  ;;  %v1312_v33 = vld [vmem:[#allocation5 + $0x18] sm:$0xff]  }
  0x4a   :  { %518 = vmatpush2.bf16.msra.mxu0 %v1248_v34  ;;  %v144_v34 = vsub.s32 0, %v1480_v45 }
  0x4b   :  { %559 = vmatpush2.bf16.msra.mxu1 %v1249_v35  ;;  %519 = vmatprep.subr.bf16.mxu0 %v1250_v36  ;;  %v140_v35 = vld [vmem:[%s1571_s2] sm:$0x3]  ;;  %v148_v36 = vsub.s32 1, %v1480_v45  ;;  %v1313_v45 = vld [vmem:[#allocation5 + $0x10] sm:$0xff]  }
  0x4c   :  { %560 = vmatprep.subr.bf16.mxu1 %v1252_v37  ;;  %v145_v37 = vrot.slane %v140_v35, %v144_v34 }
  0x4d   :  { %v149_v38 = vrot.slane %v140_v35, %v148_v36 }
  0x4e   :  { %520 = vmatpush2.bf16.msra.mxu0 %v1254_v41 }
  0x4f   :  { %561 = vmatpush2.bf16.msra.mxu1 %v1255_v42  ;;  %521 = vmatprep.subr.bf16.mxu0 %v1256_v43 }
  0x50   :  { %562 = vmatprep.subr.bf16.mxu1 %v1258_v44 }
  0x52   :  { %522 = vmatpush2.bf16.msra.mxu0 %v1260_v47 }
  0x53   :  { %563 = vmatpush2.bf16.msra.mxu1 %v1261_v48  ;;  %523 = vmatprep.subr.bf16.mxu0 %v1262_v49 }
  0x54   :  { %564 = vmatprep.subr.bf16.mxu1 %v1264_v50 }
  0x56   :  { %524 = vmatpush2.bf16.msra.mxu0 %v1266_v51 }
  0x57   :  { %565 = vmatpush2.bf16.msra.mxu1 %v1267_v52  ;;  %525 = vmatprep.subr.bf16.mxu0 %v1268_v55 }
  0x58   :  { %566 = vmatprep.subr.bf16.mxu1 %v1270_v57  ;;  %v1315_v57 = vld [vmem:[#allocation5] sm:$0xff]  }
  0x5a   :  { %526 = vmatpush2.bf16.msra.mxu0 %v1272_v58  ;;  %v1316_v58 = vld [vmem:[#allocation7 + $0x38] sm:$0xff]  }
  0x5b   :  { %567 = vmatpush2.bf16.msra.mxu1 %v1273_v60  ;;  %527 = vmatprep.subr.bf16.mxu0 %v1274_v61  ;;  %v1318_v60 = vld [vmem:[#allocation7 + $0x28] sm:$0xff]   ;;  %v1319_v61 = vld [vmem:[#allocation7 + $0x20] sm:$0xff]  }
  0x5c   :  { %568 = vmatprep.subr.bf16.mxu1 %v1276_v63  ;;  %v1321_v63 = vld [vmem:[#allocation7 + $0x10] sm:$0xff]  }
  0x5e   :  { %528 = vmatpush2.bf16.msra.mxu0 %v1278_v0 }
  0x5f   :  { %569 = vmatpush2.bf16.msra.mxu1 %v1279_v1  ;;  %529 = vmatprep.subr.bf16.mxu0 %v1280_v2  ;;  %v1070_v1 = vld [vmem:[%s1573_s4] ss:$0 sm:$0xff] }
  0x60   :  { %570 = vmatprep.subr.bf16.mxu1 %v1282_v3 }
  0x62   :  { %530 = vmatpush2.bf16.msra.mxu0 %v1284_v4 }
  0x63   :  { %571 = vmatpush2.bf16.msra.mxu1 %v1285_v5  ;;  %531 = vmatprep.subr.bf16.mxu0 %v1286_v6 }
  0x64   :  { %572 = vmatprep.subr.bf16.mxu1 %v1288_v7 }
  0x66   :  { %532 = vmatpush2.bf16.msra.mxu0 %v1290_v8 }
  0x67   :  { %573 = vmatpush2.bf16.msra.mxu1 %v1291_v9  ;;  %1105 = vmatprep.subr.bf16.mxu0 %v1292_v11  ;;  %v1322_v9 = vld [vmem:[#allocation7 + $0x8] sm:$0xff]   ;;  %v1087_v11 = vld [vmem:[%s1575_s6] ss:$0 sm:$0xff]  ;;  %s1384_s6 = scalar_lea.vmem %s996_s18, 32 }
  0x68   :  { %1145 = vmatprep.subr.bf16.mxu1 %v1418_v29  ;;  %p1385_p1 = scmp.ne.s32.totalorder %s996_s18, %s1384_s6  ;;  %p1390_p3 = scmp.lt.s32.totalorder %s1384_s6, %s1384_s6 }
  0x69   :  { %534 = vmatmul.mubr.bf16.vlgmr.msra.gmra.mxu0 %v167_v10  ;;  %v1323_v10 = vld [vmem:[#allocation7] sm:$0xff]  }
  0x6a   :  { %575 = vmatmul.mubr.bf16.vlgmr.msra.gmra.mxu1 %v175_v13  ;;  %1106 = vmatpush3.bf16.msra.mxu0 %v1293_v12  ;;  %p1391_p4 = por %p1390_p3, %p1389_p2 }
  0x6b   :  { %1107 = vmatprep.subr.bf16.mxu0 %v1294_v14  ;;  %1146 = vmatpush3.bf16.msra.mxu1 %v1308_v28 }
  0x6c   :  { %1147 = vmatprep.subr.bf16.mxu1 %v1418_v29  ;;  %1161 = vmatprep.mubr.msk.bf16.mxu1 %vm1419_vm0, %v1418_v29  ;;  %p1392_p5 = pnand %p1391_p4, %p1385_p1 }
  0x6e   :  { %1108 = vmatpush3.bf16.msra.mxu0 %v1295_v15 }
  0x6f   :  { %1109 = vmatprep.subr.bf16.mxu0 %v1296_v16  ;;  %1148 = vmatpush3.bf16.msra.mxu1 %v1309_v30 }
  0x70   :  { %1149 = vmatprep.subr.bf16.mxu1 %v1418_v29 }
  0x72   :  { %1110 = vmatpush3.bf16.msra.mxu0 %v1297_v17 }
  0x73   :  { %1111 = vmatprep.subr.bf16.mxu0 %v1298_v18  ;;  %1150 = vmatpush3.bf16.msra.mxu1 %v1310_v31 }
  0x74   :  { %1151 = vmatprep.subr.bf16.mxu1 %v1418_v29 }
  0x76   :  { %1112 = vmatpush3.bf16.msra.mxu0 %v1299_v19  ;;  %v1096_v19 = vld [vmem:[%s1577_s8] ss:$0 sm:$0xff] }
  0x77   :  { %1113 = vmatprep.subr.bf16.mxu0 %v1300_v20  ;;  %1152 = vmatpush3.bf16.msra.mxu1 %v1311_v32 }
  0x78   :  { %1153 = vmatprep.subr.bf16.mxu1 %v1418_v29 }
  0x7a   :  { %1114 = vmatpush3.bf16.msra.mxu0 %v1301_v21 }
  0x7b   :  { %1115 = vmatprep.subr.bf16.mxu0 %v1302_v22  ;;  %1154 = vmatpush3.bf16.msra.mxu1 %v1312_v33 }
  0x7c   :  { %1155 = vmatprep.subr.bf16.mxu1 %v1418_v29 }
  0x7e   :  { %1116 = vmatpush3.bf16.msra.mxu0 %v1303_v23 }
  0x7f   :  { %1117 = vmatprep.subr.bf16.mxu0 %v1304_v24  ;;  %1156 = vmatpush3.bf16.msra.mxu1 %v1313_v45 }
  0x80   :  { %1157 = vmatprep.subr.bf16.mxu1 %v1418_v29 }
  0x82   :  { %1118 = vmatpush3.bf16.msra.mxu0 %v1305_v25 }
  0x83   :  { %1119 = vmatprep.subr.bf16.mxu0 %v1306_v26  ;;  %1158 = vmatpush3.bf16.msra.mxu1 %v1314_v56 }
  0x84   :  { %1159 = vmatprep.subr.bf16.mxu1 %v1418_v29 }
  0x86   :  { %1120 = vmatpush3.bf16.msra.mxu0 %v1307_v27 }
  0x87   :  { %1165 = vmatprep.subr.bf16.mxu0 %v1418_v29  ;;  %1160 = vmatpush3.bf16.msra.mxu1 %v1315_v57 }
 0x129   :  { %v535_v39 = vpop.f32.mrf.mxu0 }
 0x12a   :  { %v576_v40 = vpop.f32.mrf.mxu1  ;;  %v536_v41 = vadd.f32 %v535_v39, %v145_v37 }
 0x12b   :  { %v537_v42 = vpop.f32.mrf.mxu0 }
 0x12c   :  { %v578_v43 = vpop.f32.mrf.mxu1  ;;  %v577_v44 = vadd.f32 %v576_v40, %v536_v41  ;;  %v538_v46 = vadd.f32 %v537_v42, %v149_v38 }
 0x12d   :  { %v539_v47 = vpop.f32.mrf.mxu0 }
 0x12e   :  { %v580_v48 = vpop.f32.mrf.mxu1  ;;  %v579_v49 = vadd.f32 %v578_v43, %v538_v46  ;;  %v583_v50 = vmax.f32 %v577_v44, 0.0 }
 0x12f   :  { %v540_v51 = vpop.f32.mrf.mxu0 }
 0x130   :  { %v581_v52 = vpop.f32.mrf.mxu1  ;;  %v584_v53 = vmax.f32 %v579_v49, 0.0  ;;  %v585_v55 = vpack.c.bf16 %v583_v50, %v583_v50 }
 0x132   :  { %v586_v54 = vpack.c.bf16 %v584_v53, %v584_v53 }
 0x134   :  { %754 = vmatprep.mubr.bf16.mxu0 %v586_v54 }
 0x135   :  { %755 = vmatmul.mubr.bf16.vlgmr.msra.gmra.mxu0 %v585_v55 }
 0x136   :  { %1181 = vmatprep.mubr.msk.bf16.mxu0 %vm1419_vm0, %v1418_v29  ;;  %1166 = vmatpush3.bf16.msra.mxu0 %v1316_v58 }
 0x137   :  { %1167 = vmatprep.subr.bf16.mxu0 %v1418_v29 }
 0x13a   :  { %1168 = vmatpush3.bf16.msra.mxu0 %v1317_v59 }
 0x13b   :  { %1169 = vmatprep.subr.bf16.mxu0 %v1418_v29 }
 0x13e   :  { %1170 = vmatpush3.bf16.msra.mxu0 %v1318_v60 }
 0x13f   :  { %1171 = vmatprep.subr.bf16.mxu0 %v1418_v29 }
 0x142   :  { %1172 = vmatpush3.bf16.msra.mxu0 %v1319_v61 }
 0x143   :  { %1173 = vmatprep.subr.bf16.mxu0 %v1418_v29 }
 0x146   :  { %1174 = vmatpush3.bf16.msra.mxu0 %v1320_v62 }
 0x147   :  { %1175 = vmatprep.subr.bf16.mxu0 %v1418_v29 }
 0x14a   :  { %1176 = vmatpush3.bf16.msra.mxu0 %v1321_v63 }
 0x14b   :  { %1177 = vmatprep.subr.bf16.mxu0 %v1418_v29 }
 0x14e   :  { %1178 = vmatpush3.bf16.msra.mxu0 %v1322_v9 }
 0x14f   :  { %1179 = vmatprep.subr.bf16.mxu0 %v1418_v29 }
 0x152   :  { %1180 = vmatpush3.bf16.msra.mxu0 %v1323_v10 }
 0x1f5   :  { %v1121_v0 = vpop.f32.mrf.mxu0 }
 0x1f7   :  { %v1122_v2 = vpop.f32.mrf.mxu0 }
 0x1f8   :  { %v1123_v3 = vadd.f32 %v1122_v2, %v1121_v0 }
 0x1f9   :  { %v1124_v4 = vpop.f32.mrf.mxu0 }
 0x1fa   :  { %v757_v5 = vadd.f32 %v1123_v3, %v1070_v1 }
 0x1fb   :  { %v1125_v6 = vpop.f32.mrf.mxu0 }
 0x1fc   :  { %v762_v7 = vmax.f32 %v757_v5, 0.0 }
 0x1fe   :  { %v763_v8 = vpack.c.bf16 %v762_v7, %v762_v7 }
 0x200   :  { %1162 = vmatmul.mubr.bf16.vlgmr.msra.gmra.mxu1 %v763_v8 }
 0x2c0   :  { %v869_v12 = vpop.f32.mrf.mxu1 }
 0x2c1   :  { %v870_v13 = vadd.f32 %v1087_v11, %v869_v12 }
 0x2c2   :  { %v1163_v14 = vpop.f32.mrf.mxu1 }
 0x2c3   :  { %v875_v15 = vmax.f32 %v870_v13, 0.0 }
 0x2c4   :  { %v872_v16 = vpop.f32.mrf.mxu1 }
 0x2c5   :  { %v876_v17 = vpack.c.bf16 %v875_v15, %v875_v15 }
 0x2c6   :  { %v1164_v18 = vpop.f32.mrf.mxu1 }
 0x2c7   :  { %1182 = vmatmul.mubr.bf16.vlgmr.msra.gmra.mxu0 %v876_v17 }
 0x387   :  { %v982_v20 = vpop.f32.mrf.mxu0 }
 0x388   :  { %v983_v21 = vadd.f32 %v1096_v19, %v982_v20 }
 0x389   :  { %v1183_v22 = vpop.f32.mrf.mxu0 }
 0x38a   :  { %988 = vst [vmem:[#allocation8] sm:$0x3] %v983_v21 }
 0x38b   :  { %v985_v23 = vpop.f32.mrf.mxu0 }
 0x38c   :  { %1395 = shalt.err (!%p1392_p5)
}
 0x38d   :  { %998 = dma.vmem_to_hbm [thread:$0]  %s996_s18, 32, %s1578_s9, [#allocation4]   ;;  %v1184_v24 = vpop.f32.mrf.mxu0 }
 0x38e   :  { %1408 = dma.done.wait [#allocation4], 32  }
 0x38f   :  { %1409 = vsyncadd [#allocation4], 4294967264 }
 0x390   :  { %1002 = vsyncpa [#allocation3], 1 }
 0x391   :  { %1003 = vsyncpa [#allocation6], 1 }
 0x392   :  { %1004 = vsyncpa [#allocation4], 1 }

</bundles_post_ra>
